<compile_context>
chip_gen: v7x
topology: tpu7x:2x2x1
jax: 0.10.0
libtpu: 0.0.40
codegen_flags: <defaults>
</compile_context>

<pallas_src>
import functools

import jax
import jax.numpy as jnp
from jax import lax
from jax.experimental import pallas as pl
from jax.experimental.pallas import tpu as pltpu

FILTERS = 64
SPEC_LEN = 49
DCT = 10
LABELS = 12
H1, W1 = 25, 5          # spatial dims after conv1 (kernel (10,4), stride 2, pad (5,1))
HP, WP = H1 + 2, 8      # halo-padded frame: 27 rows x 8 cols (W padded 5 + halo -> 8)
M = HP * WP             # 216 flat positions (multiple of 8 -> sublane aligned)
K_TAPS = 40             # conv1 im2col taps (10 x 4)
K1 = 64                 # taps padded to 64 lanes (lane-dense input DMA, aligned matmul)
NOUT = 128              # FC output padded to a full lane width (sliced to 12 outside)
BN_EPS = 1e-5

# Wrap-safety invariant for the roll-based depthwise (review note): every interior
# flat position i (1<=row<=25, 1<=col<=5) satisfies 0 <= i + d < M for every tap
# offset d = 8*(kh-1) + (kw-1), |d| <= WP + 1.  Keep this if the frame geometry changes.
assert (1 * WP + 1) - (WP + 1) >= 0 and (H1 * WP + W1) + (WP + 1) < M


# --------------------- pltpu.roll convention probe (one-off, cached) ---------------------

@functools.lru_cache(maxsize=None)
def _roll_sign() -> int:
    """+1 if pltpu.roll matches np.roll (out[i] = x[(i - shift) % n]), else -1.

    Probed once on the target backend (outside the jitted forward) so the
    depthwise tap offsets below are correct regardless of the rotation
    convention of the installed jaxlib.
    """
    def probe(x_ref, o_ref):
        o_ref[...] = pltpu.roll(x_ref[...], 1, axis=0)

    x = jnp.tile(jnp.arange(8, dtype=jnp.float32).reshape(8, 1), (1, 128))
    y = pl.pallas_call(probe, out_shape=jax.ShapeDtypeStruct((8, 128), jnp.float32))(x)
    return 1 if float(y[1, 0]) == 0.0 else -1


# ----------------------------- fused Pallas kernel -----------------------------

def _make_kernel(roll_sign: int):
    def tap_shift(d: int) -> int:
        # shift such that pltpu.roll(a, shift, axis=0)[i] == a[(i + d) % M]
        return (-roll_sign * d) % M

    def kernel(patches_ref, mask_ref, w1_ref, b1_ref,
               dww_ref, dwb_ref, pww_ref, pwb_ref,
               fcw_ref, fcb_ref, o_ref):
        mask = mask_ref[...]                                    # (216, 1): 1 on the 25x5 interior

        # conv1 (im2col) + folded BN + ReLU: bf16 MXU matmul, f32 accumulate.
        a = jnp.dot(patches_ref[0], w1_ref[...],
                    preferred_element_type=jnp.float32)         # (216, 64)
        a = jnp.maximum(a + b1_ref[...], 0.0) * mask            # halo rows exactly 0

        for blk in range(4):
            # Depthwise 3x3 (+folded BN+ReLU).  Tap (kh, kw) of output position i
            # reads a[i + d], d = 8*(kh-1) + (kw-1): realised as an XLU roll of the
            # register-resident activation (no VMEM slab, no guard rows).  Rows that
            # wrap around only land on halo outputs, which are re-masked after the
            # pointwise conv; interior outputs never wrap (module-level invariant).
            w_dw = dww_ref[blk]                                 # (9, 64), hoisted once per block
            acc = a * w_dw[4:5, :]                              # centre tap (d = 0)
            for kh in range(3):
                for kw in range(3):
                    if kh == 1 and kw == 1:
                        continue
                    d = 8 * (kh - 1) + (kw - 1)
                    t = 3 * kh + kw
                    shifted = pltpu.roll(a, tap_shift(d), axis=0)
                    acc = acc + shifted * w_dw[t:t + 1, :]
            y = jnp.maximum(acc + dwb_ref[blk], 0.0)            # (216, 64) f32

            # Pointwise 1x1 (+folded BN+ReLU) on the MXU, bf16 operands / f32 acc.
            y = jnp.dot(y.astype(jnp.bfloat16), pww_ref[blk],
                        preferred_element_type=jnp.float32)
            a = jnp.maximum(y + pwb_ref[blk], 0.0) * mask       # re-zero halo for next block

        # Head: AdaptiveAvgPool2d((1,1)) over the 125 valid positions + FC
        # (output padded to 128 lanes so the only HBM store is lane-dense).
        pooled = jnp.sum(a, axis=0, keepdims=True) * (1.0 / float(H1 * W1))   # (1, 64)
        o_ref[0] = (jnp.dot(pooled.astype(jnp.bfloat16), fcw_ref[...],
                            preferred_element_type=jnp.float32) + fcb_ref[...])

    return kernel


# ----------------------------- pallas_call wrapper -----------------------------

def _rep2(arr):
    return pl.BlockSpec(arr.shape, lambda b: (0, 0))


def _rep3(arr):
    return pl.BlockSpec(arr.shape, lambda b: (0, 0, 0))


def dscnn_pallas(patches, mask, w1, b1, dww, dwb, pww, pwb, fcw, fcb, roll_sign):
    B = patches.shape[0]
    return pl.pallas_call(
        _make_kernel(roll_sign),
        out_shape=jax.ShapeDtypeStruct((B, 1, NOUT), jnp.float32),
        grid=(B,),
        in_specs=[
            pl.BlockSpec((1, M, K1), lambda b: (b, 0, 0)),
            _rep2(mask), _rep2(w1), _rep2(b1),
            _rep3(dww), _rep3(dwb), _rep3(pww), _rep3(pwb),
            _rep2(fcw), _rep2(fcb),
        ],
        out_specs=pl.BlockSpec((1, 1, NOUT), lambda b: (b, 0, 0)),
        compiler_params=pltpu.CompilerParams(dimension_semantics=("parallel",)),
    )(patches, mask, w1, b1, dww, dwb, pww, pwb, fcw, fcb)


# ----------------------------- parameters & glue -----------------------------

def init_params(seed=0):
    key = jax.random.PRNGKey(seed)

    def nxt():
        nonlocal key
        key, sub = jax.random.split(key)
        return sub

    def nrm(shape, scale=0.1):
        return scale * jax.random.normal(nxt(), shape, dtype=jnp.float32)

    def bn_params():
        g = jax.random.uniform(nxt(), (FILTERS,), jnp.float32, 0.8, 1.2)
        b = nrm((FILTERS,))
        m = nrm((FILTERS,))
        v = jax.random.uniform(nxt(), (FILTERS,), jnp.float32, 0.5, 1.5)
        return (g, b, m, v)

    p = {}
    p['conv1_w'] = nrm((FILTERS, 1, 10, 4))
    p['conv1_b'] = nrm((FILTERS,))
    p['bn1'] = bn_params()
    for i in range(2, 6):
        p[f'dw{i}_w'] = nrm((FILTERS, 1, 3, 3))
        p[f'dw{i}_b'] = nrm((FILTERS,))
        p[f'bn{i}1'] = bn_params()
        p[f'pw{i}_w'] = nrm((FILTERS, FILTERS, 1, 1))
        p[f'pw{i}_b'] = nrm((FILTERS,))
        p[f'bn{i}2'] = bn_params()
    p['fc_w'] = nrm((LABELS, FILTERS))
    p['fc_b'] = nrm((LABELS,))
    return p


def fold_bn(conv_bias, bn):
    g, b, m, v = bn
    s = g / jnp.sqrt(v + BN_EPS)
    return s, (conv_bias - m) * s + b


@functools.partial(jax.jit, static_argnums=(2,))
def _forward_impl(x_nchw, params, roll_sign):
    B = x_nchw.shape[0]
    x = x_nchw[:, 0].astype(jnp.float32)                          # (B, 49, 10): 1 input channel

    # conv1 im2col on the ~2 KB raw input (static strided slices, no gather), emitted
    # directly in the kernel's halo-padded (27, 8) row order and padded to 64 bf16
    # lanes so the per-sample input DMA is lane-dense and the in-kernel conv1 is a
    # single aligned (216, 64) @ (64, 64) MXU matmul with no reshapes.
    xpad = jnp.pad(x, ((0, 0), (5, 5), (1, 1)))                   # (B, 59, 12)
    taps = [xpad[:, kh:kh + 2 * H1:2, kw:kw + 2 * W1:2]           # 40 x (B, 25, 5)
            for kh in range(10) for kw in range(4)]
    patches = jnp.stack(taps, axis=-1)                            # (B, 25, 5, 40)
    patches = jnp.pad(patches, ((0, 0), (1, 1), (1, 2), (0, K1 - K_TAPS)))  # (B, 27, 8, 64)
    patches = patches.reshape(B, M, K1).astype(jnp.bfloat16)      # (B, 216, 64) bf16

    # interior mask of the halo-padded layout (1 on the 25x5 valid positions)
    idx = jnp.arange(M)
    ii, jj = idx // WP, idx % WP
    mask = ((ii >= 1) & (ii <= H1) & (jj >= 1) & (jj <= W1)).astype(jnp.float32).reshape(M, 1)

    # fold eval-mode BatchNorms into the conv weights / biases
    s1, c1 = fold_bn(params['conv1_b'], params['bn1'])
    w1 = params['conv1_w'].reshape(FILTERS, K_TAPS).T * s1[None, :]          # (40, 64)
    w1 = jnp.pad(w1, ((0, K1 - K_TAPS), (0, 0))).astype(jnp.bfloat16)        # (64, 64) bf16
    b1 = c1.reshape(1, FILTERS)

    dww, dwb, pww, pwb = [], [], [], []
    for i in range(2, 6):
        sd, cd = fold_bn(params[f'dw{i}_b'], params[f'bn{i}1'])
        dww.append(params[f'dw{i}_w'][:, 0].reshape(FILTERS, 9).T * sd[None, :])   # (9, 64) f32
        dwb.append(cd.reshape(1, FILTERS))
        sp, cp = fold_bn(params[f'pw{i}_b'], params[f'bn{i}2'])
        pww.append((params[f'pw{i}_w'][:, :, 0, 0].T * sp[None, :]).astype(jnp.bfloat16))
        pwb.append(cp.reshape(1, FILTERS))
    dww = jnp.stack(dww)                                          # (4, 9, 64)  f32
    dwb = jnp.stack(dwb)                                          # (4, 1, 64)  f32
    pww = jnp.stack(pww)                                          # (4, 64, 64) bf16
    pwb = jnp.stack(pwb)                                          # (4, 1, 64)  f32

    fcw = jnp.pad(params['fc_w'].T, ((0, 0), (0, NOUT - LABELS))).astype(jnp.bfloat16)  # (64,128)
    fcb = jnp.pad(params['fc_b'], (0, NOUT - LABELS)).reshape(1, NOUT)

    out = dscnn_pallas(patches, mask, w1, b1, dww, dwb, pww, pwb, fcw, fcb, roll_sign)
    return out[:, 0, :LABELS]


def dscnn_forward(x_nchw, params):
    # The roll-convention probe runs eagerly (and is cached) before jit tracing.
    return _forward_impl(x_nchw, params, _roll_sign())


# ----------------------------- pure-JAX reference (validation) -----------------------------

def _bn_nchw(y, g, b, m, v):
    inv = 1.0 / jnp.sqrt(v + BN_EPS)
    return (y - m[None, :, None, None]) * (g * inv)[None, :, None, None] + b[None, :, None, None]


def ref_forward(x, p):
    y = lax.conv_general_dilated(x, p['conv1_w'], (2, 2), [(5, 5), (1, 1)],
                                 dimension_numbers=('NCHW', 'OIHW', 'NCHW'))
    y = jax.nn.relu(_bn_nchw(y + p['conv1_b'][None, :, None, None], *p['bn1']))
    for i in range(2, 6):
        y = lax.conv_general_dilated(y, p[f'dw{i}_w'], (1, 1), [(1, 1), (1, 1)],
                                     dimension_numbers=('NCHW', 'OIHW', 'NCHW'),
                                     feature_group_count=FILTERS)
        y = jax.nn.relu(_bn_nchw(y + p[f'dw{i}_b'][None, :, None, None], *p[f'bn{i}1']))
        y = lax.conv_general_dilated(y, p[f'pw{i}_w'], (1, 1), [(0, 0), (0, 0)],
                                     dimension_numbers=('NCHW', 'OIHW', 'NCHW'))
        y = jax.nn.relu(_bn_nchw(y + p[f'pw{i}_b'][None, :, None, None], *p[f'bn{i}2']))
    pooled = y.mean(axis=(2, 3))
    return pooled @ p['fc_w'].T + p['fc_b']


if __name__ == "__main__":
    key = jax.random.PRNGKey(0)
    x = jax.random.normal(key, (2, 1, SPEC_LEN, DCT), dtype=jnp.float32)  # NCHW like PyTorch
    params = init_params(0)

    out = jax.block_until_ready(dscnn_forward(x, params))
    assert out.shape == (2, LABELS)

    ref = ref_forward(x, params)
    err = float(jnp.max(jnp.abs(out - ref)))
    # bf16 MXU operands (per the perf review) -> bf16-level numeric tolerance vs f32 reference.
    assert err < 5e-2, f"mismatch vs reference: max abs err = {err}"

    print("KERNEL_OK")
</pallas_src>

<mosaic_0001>
module attributes {stable_mosaic.version = 11 : i64} {
  func.func @probe(%arg0: memref<8x128xf32, #tpu.memory_space<vmem>>, %arg1: memref<8x128xf32, #tpu.memory_space<vmem>>) attributes {dimension_semantics = [], scalar_prefetch = 0 : i64, scratch_operands = 0 : i64, tpu.core_type = #tpu.core_type<tc>} {
    %c0 = arith.constant 0 : index
    %c0_0 = arith.constant 0 : index
    %0 = vector.load %arg0[%c0, %c0_0] : memref<8x128xf32, #tpu.memory_space<vmem>>, vector<8x128xf32>
    %c1_i32 = arith.constant 1 : i32
    %1 = tpu.dynamic_rotate %0 by %c1_i32 dim 0 : vector<8x128xf32>, i32 -> vector<8x128xf32>
    %c0_1 = arith.constant 0 : index
    %c0_2 = arith.constant 0 : index
    %2 = vector.load %arg1[%c0_1, %c0_2] : memref<8x128xf32, #tpu.memory_space<vmem>>, vector<8x128xf32>
    tpu.vector_store %arg1[%c0_1, %c0_2], %1 {strides = array<i32>} : memref<8x128xf32, #tpu.memory_space<vmem>>, vector<8x128xf32>,
    return
  }
}

</mosaic_0001>

<bundles_post_ra>
// kernel: tpu_custom_call.1
= control target key start
LH: loop header
LB: loop body
LE: loop exit
PB: predicated region body
PF: predicated region fallthrough
CT: control target
= control target key end

     0   :  { %6 = vsyncpa [#allocation3], 0  ;;  %s125_s0 = inlined_call_operand.hbm [shape: f32[8,128], index: 0, kind: input, shape index: {}]   ;;  %s126_s1 = inlined_call_operand.hbm [shape: f32[8,128], index: 1, kind: output, shape index: {}]  }
   0x1   :  { %7 = vsyncpa [#allocation4], 0  ;;  %s89_s6 = smov [#allocation2]   ;;  %s41_s10 = scalar_lea.hbm %s125_s0, 128 }
   0x2   :  { %s14_s7 = sshll.u32 %s89_s6, 4  ;;  %p42_p0 = scmp.ne.s32.totalorder %s125_s0, %s41_s10  ;;  %s15_s7 = int_to_ptr.vmem [resolvable:$true] %s14_s7 }
   0x3   :  { %p45_p1 = scmp.lt.u32.totalorder %s41_s10, %s125_s0 }
   0x5   :  { %p47_p2 = pnand %p45_p1, %p42_p0 }
   0x7   :  { %50 = shalt.err (!%p47_p2)
}
   0x8   :  { %s51_s15 = scalar_lea.vmem %s15_s7, 128  ;;  %p56_p4 = scmp.lt.s32.totalorder %s15_s7, %s15_s7 }
   0x9   :  { %p52_p3 = scmp.ne.s32.totalorder %s15_s7, %s51_s15  ;;  %p57_p5 = scmp.lt.s32.totalorder %s51_s15, %s51_s15 }
   0xb   :  { %p58_p6 = por %p57_p5, %p56_p4 }
   0xd   :  { %p59_p7 = pnand %p58_p6, %p52_p3 }
   0xf   :  { %62 = shalt.err (!%p59_p7)
}
  0x10   :  { %17 = dma.hbm_to_vmem [thread:$0]  %s125_s0, 128, %s15_s7, [#allocation3]  }
  0x11   :  { %85 = dma.done.wait [#allocation3], 128  }
  0x12   :  { %86 = vsyncadd [#allocation3], 4294967168  ;;  %s90_s18 = smov [#allocation5]   ;;  %v21_v0 = vld [vmem:[#allocation2] sm:$0xff] }
  0x13   :  { %s30_s19 = sshll.u32 %s90_s18, 4  ;;  %v22_v1 = vrot.slane %v21_v0, 7  ;;  %s31_s19 = int_to_ptr.vmem [resolvable:$true] %s30_s19 }
  0x14   :  { %s63_s20 = scalar_lea.vmem %s31_s19, 128  ;;  %p68_p9 = scmp.lt.s32.totalorder %s31_s19, %s31_s19 }
  0x15   :  { %23 = vst [vmem:[#allocation5] sm:$0xff] %v22_v1  ;;  %p64_p8 = scmp.ne.s32.totalorder %s31_s19, %s63_s20  ;;  %p69_p10 = scmp.lt.s32.totalorder %s63_s20, %s63_s20 }
  0x17   :  { %p70_p11 = por %p69_p10, %p68_p9 }
  0x19   :  { %p71_p12 = pnand %p70_p11, %p64_p8 }
  0x1b   :  { %74 = shalt.err (!%p71_p12)
}
  0x1c   :  { %s75_s23 = scalar_lea.hbm %s126_s1, 128 }
  0x1d   :  { %p76_p13 = scmp.ne.s32.totalorder %s126_s1, %s75_s23  ;;  %p79_p0 = scmp.lt.u32.totalorder %s75_s23, %s126_s1 }
  0x1f   :  { %p81_p1 = pnand %p79_p0, %p76_p13 }
  0x21   :  { %84 = shalt.err (!%p81_p1)
}
  0x22   :  { %33 = dma.vmem_to_hbm [thread:$0]  %s31_s19, 128, %s126_s1, [#allocation4]  }
  0x23   :  { %87 = dma.done.wait [#allocation4], 128  }
  0x24   :  { %88 = vsyncadd [#allocation4], 4294967168 }
  0x25   :  { %37 = vsyncpa [#allocation3], 1 }
  0x26   :  { %38 = vsyncpa [#allocation4], 1 }

</bundles_post_ra>
